<compile_context>
chip_gen: v6e
topology: v6e:2x2x1
jax: 0.10.0
libtpu: 0.0.40
codegen_flags: <defaults>
</compile_context>

<pallas_src>
import functools

import jax
import jax.numpy as jnp
from jax.experimental import pallas as pl
from jax.experimental.pallas import tpu as pltpu

# Finite "minus infinity" so masked lanes underflow exp() to 0 without NaNs.
_MASK_VALUE = -0.7 * float(jnp.finfo(jnp.float32).max)


def _attention_kernel(
    xq_ref, xkv_ref, wq_ref, wk_ref, wv_ref, wo_ref, bo_ref,   # inputs
    o_ref,                                                     # output
    q_scr, m_scr, l_scr, acc_scr,                              # scratch
    *, causal, tq, tk,
):
    qi = pl.program_id(1)
    ki = pl.program_id(2)
    nk = pl.num_programs(2)

    # ---- init: once per (batch, q-tile) ----------------------------------
    @pl.when(ki == 0)
    def _():
        # q projection (softmax scale already folded into wq on the host).
        # MXU operands stay in the input dtype; accumulate in f32.
        q = jnp.dot(xq_ref[0], wq_ref[...], preferred_element_type=jnp.float32)
        q_scr[...] = q.astype(q_scr.dtype)
        m_scr[...] = jnp.full(m_scr.shape, -jnp.inf, dtype=m_scr.dtype)
        l_scr[...] = jnp.zeros_like(l_scr)
        acc_scr[...] = jnp.zeros_like(acc_scr)

    q_start = qi * tq
    kv_start = ki * tk

    def _process_kv_tile():
        xkv = xkv_ref[0]                                            # (tk, dim_in)
        k = jnp.dot(xkv, wk_ref[...],
                    preferred_element_type=jnp.float32).astype(xkv.dtype)
        v = jnp.dot(xkv, wv_ref[...],
                    preferred_element_type=jnp.float32).astype(xkv.dtype)
        q = q_scr[...]                                              # (tq, dim_inner)

        # s[i, j] = sum_d q[i, d] * k[j, d]  (contraction expressed directly,
        # no explicit transpose of k).
        s = jax.lax.dot_general(
            q, k, dimension_numbers=(((1,), (1,)), ((), ())),
            preferred_element_type=jnp.float32)                     # (tq, tk) f32

        if causal:
            row = q_start + jax.lax.broadcasted_iota(jnp.int32, (tq, tk), 0)
            col = kv_start + jax.lax.broadcasted_iota(jnp.int32, (tq, tk), 1)
            s = jnp.where(col > row, _MASK_VALUE, s)

        # online softmax (statistics in f32)
        m_prev = m_scr[...]
        m_new = jnp.maximum(m_prev, jnp.max(s, axis=-1, keepdims=True))
        alpha = jnp.exp(m_prev - m_new)
        p = jnp.exp(s - m_new)
        l_scr[...] = alpha * l_scr[...] + jnp.sum(p, axis=-1, keepdims=True)
        acc_scr[...] = alpha * acc_scr[...] + jnp.dot(
            p.astype(v.dtype), v, preferred_element_type=jnp.float32)
        m_scr[...] = m_new

    if causal:
        # Skip kv tiles that lie entirely in the masked future of this q tile.
        @pl.when(kv_start <= q_start + (tq - 1))
        def _():
            _process_kv_tile()
    else:
        _process_kv_tile()

    # ---- finalize: once per (batch, q-tile) ------------------------------
    @pl.when(ki == nk - 1)
    def _():
        l = l_scr[...]
        inv_l = pl.reciprocal(l, approx=True)
        inv_l = inv_l * (2.0 - l * inv_l)          # one Newton step (cheap, (tq,1))
        out = acc_scr[...] * inv_l                 # (tq, dim_inner) f32
        y = jnp.dot(out.astype(wo_ref.dtype), wo_ref[...],
                    preferred_element_type=jnp.float32)
        y = y + bo_ref[...].astype(jnp.float32)
        o_ref[0] = y.astype(o_ref.dtype)


def _pick_tile(n, target):
    """Use `target` if it tiles the axis evenly, else fall back to the full axis."""
    if n <= target:
        return n
    if n % target == 0:
        return target
    return n  # TODO(synk): support ragged N with a masked tail tile.


def attention_pallas(x, w_qkv, w_out, b_out, *, causal=False,
                     q_tile=128, kv_tile=128):
    """x: (B, N, dim_in); w_qkv: (dim_in, 3*dim_inner); w_out: (dim_inner, dim_out);
    b_out: (dim_out,). Returns (B, N, dim_out)."""
    B, N, dim_in = x.shape
    three_inner = w_qkv.shape[1]
    dim_inner = three_inner // 3
    dim_out = w_out.shape[1]
    scale = float(dim_inner) ** -0.5

    tq = _pick_tile(N, q_tile)
    tk = _pick_tile(N, kv_tile)
    n_q = N // tq
    n_kv = N // tk

    # Host-side: split the fused qkv weight and fold the softmax scale into
    # the q projection (O(dim_in*dim_inner) once, instead of O(N^2) per call).
    w_q = (w_qkv[:, :dim_inner] * scale).astype(w_qkv.dtype)
    w_k = w_qkv[:, dim_inner:2 * dim_inner]
    w_v = w_qkv[:, 2 * dim_inner:]
    b_out2d = b_out.reshape(1, dim_out)

    kernel = functools.partial(_attention_kernel, causal=causal, tq=tq, tk=tk)

    # TODO(synk): if dim_out is not a multiple of 128, output stores are masked
    # (vst.msk); pad the output projection for lane-dense stores if it matters.
    return pl.pallas_call(
        kernel,
        out_shape=jax.ShapeDtypeStruct((B, N, dim_out), x.dtype),
        grid_spec=pltpu.PrefetchScalarGridSpec(
            num_scalar_prefetch=0,
            grid=(B, n_q, n_kv),
            in_specs=[
                pl.BlockSpec((1, tq, dim_in), lambda b, i, j: (b, i, 0)),    # x (q rows)
                pl.BlockSpec((1, tk, dim_in), lambda b, i, j: (b, j, 0)),    # x (kv rows)
                pl.BlockSpec((dim_in, dim_inner), lambda b, i, j: (0, 0)),   # w_q (scaled)
                pl.BlockSpec((dim_in, dim_inner), lambda b, i, j: (0, 0)),   # w_k
                pl.BlockSpec((dim_in, dim_inner), lambda b, i, j: (0, 0)),   # w_v
                pl.BlockSpec((dim_inner, dim_out), lambda b, i, j: (0, 0)),  # w_out
                pl.BlockSpec((1, dim_out), lambda b, i, j: (0, 0)),          # b_out
            ],
            out_specs=pl.BlockSpec((1, tq, dim_out), lambda b, i, j: (b, i, 0)),
            scratch_shapes=[
                pltpu.VMEM((tq, dim_inner), x.dtype),      # cached (scaled) q tile
                pltpu.VMEM((tq, 1), jnp.float32),          # running max
                pltpu.VMEM((tq, 1), jnp.float32),          # running sum
                pltpu.VMEM((tq, dim_inner), jnp.float32),  # output accumulator
            ],
        ),
        compiler_params=pltpu.CompilerParams(
            dimension_semantics=("parallel", "parallel", "arbitrary"),
            vmem_limit_bytes=64 * 1024 * 1024,
        ),
    )(x, x, w_q, w_k, w_v, w_out, b_out2d)


def attention_reference(x, w_qkv, w_out, b_out, *, causal=False):
    """Pure-JAX reference mirroring the PyTorch forward exactly."""
    dim_inner = w_qkv.shape[1] // 3
    scale = float(dim_inner) ** -0.5
    qkv = jnp.einsum("bnd,de->bne", x, w_qkv)
    q, k, v = jnp.split(qkv, 3, axis=-1)
    sim = jnp.einsum("bid,bjd->bij", q, k) * scale
    if causal:
        n = sim.shape[-1]
        mask = jnp.triu(jnp.ones((n, n), dtype=bool), k=1)
        sim = jnp.where(mask[None], -jnp.finfo(q.dtype).max, sim)
    attn = jax.nn.softmax(sim, axis=-1)
    out = jnp.einsum("bij,bjd->bid", attn, v)
    return jnp.einsum("bid,de->bie", out, w_out) + b_out


def _make_inputs(key, B, N, dim_in, dim_inner, dim_out):
    kx, kqkv, kwo, kbo = jax.random.split(key, 4)
    x = jax.random.normal(kx, (B, N, dim_in), dtype=jnp.float32)
    # PyTorch Linear weight is (out_features, in_features); we store the transpose.
    w_qkv = jax.random.normal(kqkv, (dim_in, 3 * dim_inner), dtype=jnp.float32) * 0.1
    w_out = jax.random.normal(kwo, (dim_inner, dim_out), dtype=jnp.float32) * 0.1
    b_out = jax.random.normal(kbo, (dim_out,), dtype=jnp.float32) * 0.1
    return x, w_qkv, w_out, b_out


if __name__ == "__main__":
    key = jax.random.PRNGKey(0)
    k_small, k_big = jax.random.split(key)

    # Small shapes consistent with the module's forward: x is (B, N, dim_in).
    x, w_qkv, w_out, b_out = _make_inputs(k_small, B=2, N=8,
                                          dim_in=32, dim_inner=32, dim_out=32)
    y = jax.block_until_ready(attention_pallas(x, w_qkv, w_out, b_out, causal=False))
    y_ref = attention_reference(x, w_qkv, w_out, b_out, causal=False)
    assert jnp.allclose(y, y_ref, atol=1e-3, rtol=1e-3), "mismatch vs reference"

    yc = jax.block_until_ready(attention_pallas(x, w_qkv, w_out, b_out, causal=True))
    yc_ref = attention_reference(x, w_qkv, w_out, b_out, causal=True)
    assert jnp.allclose(yc, yc_ref, atol=1e-3, rtol=1e-3), "causal mismatch vs reference"

    # Slightly larger case to exercise the tiled / online-softmax path
    # (grid = (2, 2, 2): multiple q tiles, multiple kv tiles, causal tile skip).
    xb, wqkvb, woutb, boutb = _make_inputs(k_big, B=2, N=256,
                                           dim_in=64, dim_inner=64, dim_out=64)
    yb = jax.block_until_ready(attention_pallas(xb, wqkvb, woutb, boutb, causal=False))
    yb_ref = attention_reference(xb, wqkvb, woutb, boutb, causal=False)
    assert jnp.allclose(yb, yb_ref, atol=1e-3, rtol=1e-3), "tiled mismatch vs reference"

    ybc = jax.block_until_ready(attention_pallas(xb, wqkvb, woutb, boutb, causal=True))
    ybc_ref = attention_reference(xb, wqkvb, woutb, boutb, causal=True)
    assert jnp.allclose(ybc, ybc_ref, atol=1e-3, rtol=1e-3), "tiled causal mismatch vs reference"

    print("KERNEL_OK")
</pallas_src>

<mosaic_0001>
module attributes {stable_mosaic.version = 11 : i64} {
  func.func @_attention_kernel(%arg0: i32, %arg1: i32, %arg2: i32, %arg3: memref<1x8x32xf32, #tpu.memory_space<vmem>>, %arg4: memref<1x8x32xf32, #tpu.memory_space<vmem>>, %arg5: memref<32x32xf32, #tpu.memory_space<vmem>>, %arg6: memref<32x32xf32, #tpu.memory_space<vmem>>, %arg7: memref<32x32xf32, #tpu.memory_space<vmem>>, %arg8: memref<32x32xf32, #tpu.memory_space<vmem>>, %arg9: memref<1x32xf32, #tpu.memory_space<vmem>>, %arg10: memref<1x8x32xf32, #tpu.memory_space<vmem>>, %arg11: memref<8x32xf32, #tpu.memory_space<vmem>>, %arg12: memref<8x1xf32, #tpu.memory_space<vmem>>, %arg13: memref<8x1xf32, #tpu.memory_space<vmem>>, %arg14: memref<8x32xf32, #tpu.memory_space<vmem>>) attributes {dimension_semantics = [#tpu.dimension_semantics<parallel>, #tpu.dimension_semantics<parallel>, #tpu.dimension_semantics<arbitrary>], iteration_bounds = array<i64: 2, 1, 1>, scalar_prefetch = 0 : i64, scratch_operands = 4 : i64, tpu.core_type = #tpu.core_type<tc>, window_params = [{transform_indices = @transform_0, window_bounds = array<i64: 1, 8, 32>}, {transform_indices = @transform_1, window_bounds = array<i64: 1, 8, 32>}, {pipeline_mode = #tpu.pipeline_mode<synchronous>, transform_indices = @transform_2, window_bounds = array<i64: 32, 32>}, {pipeline_mode = #tpu.pipeline_mode<synchronous>, transform_indices = @transform_3, window_bounds = array<i64: 32, 32>}, {pipeline_mode = #tpu.pipeline_mode<synchronous>, transform_indices = @transform_4, window_bounds = array<i64: 32, 32>}, {pipeline_mode = #tpu.pipeline_mode<synchronous>, transform_indices = @transform_5, window_bounds = array<i64: 32, 32>}, {pipeline_mode = #tpu.pipeline_mode<synchronous>, transform_indices = @transform_6, window_bounds = array<i64: 1, 32>}, {transform_indices = @transform_7, window_bounds = array<i64: 1, 8, 32>}]} {
    %c0_i32 = arith.constant 0 : i32
    %0 = arith.cmpi eq, %arg2, %c0_i32 : i32
    %1 = arith.extui %0 : i1 to i32
    %c0_i32_0 = arith.constant 0 : i32
    %2 = arith.cmpi ne, %1, %c0_i32_0 : i32
    scf.if %2 {
      %c0_28 = arith.constant 0 : index
      %c0_29 = arith.constant 0 : index
      %c0_30 = arith.constant 0 : index
      %36 = vector.load %arg3[%c0_28, %c0_29, %c0_30] : memref<1x8x32xf32, #tpu.memory_space<vmem>>, vector<1x8x32xf32>
      %37 = vector.shape_cast %36 : vector<1x8x32xf32> to vector<8x32xf32>
      %c0_31 = arith.constant 0 : index
      %c0_32 = arith.constant 0 : index
      %38 = vector.load %arg5[%c0_31, %c0_32] : memref<32x32xf32, #tpu.memory_space<vmem>>, vector<32x32xf32>
      %cst_33 = arith.constant dense<0.000000e+00> : vector<8x32xf32>
      %39 = tpu.matmul %37, %38, %cst_33 {dimension_numbers = #tpu.dot_dimension_numbers<[1], [0], [0], [1], [0, 0, 1, 1], [], []>} : vector<8x32xf32>, vector<32x32xf32>, vector<8x32xf32> -> vector<8x32xf32>
      %c0_34 = arith.constant 0 : index
      %c0_35 = arith.constant 0 : index
      %40 = vector.load %arg11[%c0_34, %c0_35] : memref<8x32xf32, #tpu.memory_space<vmem>>, vector<8x32xf32>
      tpu.vector_store %arg11[%c0_34, %c0_35], %39 {strides = array<i32>} : memref<8x32xf32, #tpu.memory_space<vmem>>, vector<8x32xf32>,
      %cst_36 = arith.constant 0xFF800000 : f32
      %41 = vector.broadcast %cst_36 : f32 to vector<8x1xf32>
      %c0_37 = arith.constant 0 : index
      %c0_38 = arith.constant 0 : index
      %42 = vector.load %arg12[%c0_37, %c0_38] : memref<8x1xf32, #tpu.memory_space<vmem>>, vector<8x1xf32>
      tpu.vector_store %arg12[%c0_37, %c0_38], %41 {strides = array<i32>} : memref<8x1xf32, #tpu.memory_space<vmem>>, vector<8x1xf32>,
      %cst_39 = arith.constant 0.000000e+00 : f32
      %43 = vector.broadcast %cst_39 : f32 to vector<8x1xf32>
      %c0_40 = arith.constant 0 : index
      %c0_41 = arith.constant 0 : index
      %44 = vector.load %arg13[%c0_40, %c0_41] : memref<8x1xf32, #tpu.memory_space<vmem>>, vector<8x1xf32>
      tpu.vector_store %arg13[%c0_40, %c0_41], %43 {strides = array<i32>} : memref<8x1xf32, #tpu.memory_space<vmem>>, vector<8x1xf32>,
      %cst_42 = arith.constant 0.000000e+00 : f32
      %45 = vector.broadcast %cst_42 : f32 to vector<8x32xf32>
      %c0_43 = arith.constant 0 : index
      %c0_44 = arith.constant 0 : index
      %46 = vector.load %arg14[%c0_43, %c0_44] : memref<8x32xf32, #tpu.memory_space<vmem>>, vector<8x32xf32>
      tpu.vector_store %arg14[%c0_43, %c0_44], %45 {strides = array<i32>} : memref<8x32xf32, #tpu.memory_space<vmem>>, vector<8x32xf32>,
    } else {
    }
    %c0 = arith.constant 0 : index
    %c0_1 = arith.constant 0 : index
    %c0_2 = arith.constant 0 : index
    %3 = vector.load %arg4[%c0, %c0_1, %c0_2] : memref<1x8x32xf32, #tpu.memory_space<vmem>>, vector<1x8x32xf32>
    %4 = vector.shape_cast %3 : vector<1x8x32xf32> to vector<8x32xf32>
    %c0_3 = arith.constant 0 : index
    %c0_4 = arith.constant 0 : index
    %5 = vector.load %arg6[%c0_3, %c0_4] : memref<32x32xf32, #tpu.memory_space<vmem>>, vector<32x32xf32>
    %cst = arith.constant dense<0.000000e+00> : vector<8x32xf32>
    %6 = tpu.matmul %4, %5, %cst {dimension_numbers = #tpu.dot_dimension_numbers<[1], [0], [0], [1], [0, 0, 1, 1], [], []>} : vector<8x32xf32>, vector<32x32xf32>, vector<8x32xf32> -> vector<8x32xf32>
    %c0_5 = arith.constant 0 : index
    %c0_6 = arith.constant 0 : index
    %7 = vector.load %arg7[%c0_5, %c0_6] : memref<32x32xf32, #tpu.memory_space<vmem>>, vector<32x32xf32>
    %cst_7 = arith.constant dense<0.000000e+00> : vector<8x32xf32>
    %8 = tpu.matmul %4, %7, %cst_7 {dimension_numbers = #tpu.dot_dimension_numbers<[1], [0], [0], [1], [0, 0, 1, 1], [], []>} : vector<8x32xf32>, vector<32x32xf32>, vector<8x32xf32> -> vector<8x32xf32>
    %c0_8 = arith.constant 0 : index
    %c0_9 = arith.constant 0 : index
    %9 = vector.load %arg11[%c0_8, %c0_9] : memref<8x32xf32, #tpu.memory_space<vmem>>, vector<8x32xf32>
    %cst_10 = arith.constant dense<0.000000e+00> : vector<8x8xf32>
    %10 = tpu.matmul %9, %6, %cst_10 {dimension_numbers = #tpu.dot_dimension_numbers<[1], [1], [0], [0], [0, 0, 1, 0], [], []>} : vector<8x32xf32>, vector<8x32xf32>, vector<8x8xf32> -> vector<8x8xf32>
    %c0_11 = arith.constant 0 : index
    %c0_12 = arith.constant 0 : index
    %11 = vector.load %arg12[%c0_11, %c0_12] : memref<8x1xf32, #tpu.memory_space<vmem>>, vector<8x1xf32>
    %cst_13 = arith.constant dense<0xFF800000> : vector<8xf32>
    %12 = vector.multi_reduction <maximumf>, %10, %cst_13 [1] : vector<8x8xf32> to vector<8xf32>
    %13 = vector.shape_cast %12 : vector<8xf32> to vector<8x1xf32>
    %14 = arith.maximumf %11, %13 : vector<8x1xf32>
    %15 = arith.subf %11, %14 : vector<8x1xf32>
    %16 = math.exp %15 : vector<8x1xf32>
    %17 = vector.broadcast %14 : vector<8x1xf32> to vector<8x8xf32>
    %18 = arith.subf %10, %17 : vector<8x8xf32>
    %19 = math.exp %18 : vector<8x8xf32>
    %c0_14 = arith.constant 0 : index
    %c0_15 = arith.constant 0 : index
    %20 = vector.load %arg13[%c0_14, %c0_15] : memref<8x1xf32, #tpu.memory_space<vmem>>, vector<8x1xf32>
    %21 = arith.mulf %16, %20 : vector<8x1xf32>
    %cst_16 = arith.constant dense<0.000000e+00> : vector<8xf32>
    %22 = vector.multi_reduction <add>, %19, %cst_16 [1] : vector<8x8xf32> to vector<8xf32>
    %23 = vector.shape_cast %22 : vector<8xf32> to vector<8x1xf32>
    %24 = arith.addf %21, %23 : vector<8x1xf32>
    %c0_17 = arith.constant 0 : index
    %c0_18 = arith.constant 0 : index
    %25 = vector.load %arg13[%c0_17, %c0_18] : memref<8x1xf32, #tpu.memory_space<vmem>>, vector<8x1xf32>
    tpu.vector_store %arg13[%c0_17, %c0_18], %24 {strides = array<i32>} : memref<8x1xf32, #tpu.memory_space<vmem>>, vector<8x1xf32>,
    %c0_19 = arith.constant 0 : index
    %c0_20 = arith.constant 0 : index
    %26 = vector.load %arg14[%c0_19, %c0_20] : memref<8x32xf32, #tpu.memory_space<vmem>>, vector<8x32xf32>
    %27 = vector.broadcast %16 : vector<8x1xf32> to vector<8x32xf32>
    %28 = arith.mulf %27, %26 : vector<8x32xf32>
    %cst_21 = arith.constant dense<0.000000e+00> : vector<8x32xf32>
    %29 = tpu.matmul %19, %8, %cst_21 {dimension_numbers = #tpu.dot_dimension_numbers<[1], [0], [0], [1], [0, 0, 1, 1], [], []>} : vector<8x8xf32>, vector<8x32xf32>, vector<8x32xf32> -> vector<8x32xf32>
    %30 = arith.addf %28, %29 : vector<8x32xf32>
    %c0_22 = arith.constant 0 : index
    %c0_23 = arith.constant 0 : index
    %31 = vector.load %arg14[%c0_22, %c0_23] : memref<8x32xf32, #tpu.memory_space<vmem>>, vector<8x32xf32>
    tpu.vector_store %arg14[%c0_22, %c0_23], %30 {strides = array<i32>} : memref<8x32xf32, #tpu.memory_space<vmem>>, vector<8x32xf32>,
    %c0_24 = arith.constant 0 : index
    %c0_25 = arith.constant 0 : index
    %32 = vector.load %arg12[%c0_24, %c0_25] : memref<8x1xf32, #tpu.memory_space<vmem>>, vector<8x1xf32>
    tpu.vector_store %arg12[%c0_24, %c0_25], %14 {strides = array<i32>} : memref<8x1xf32, #tpu.memory_space<vmem>>, vector<8x1xf32>,
    %c0_i32_26 = arith.constant 0 : i32
    %33 = arith.cmpi eq, %arg2, %c0_i32_26 : i32
    %34 = arith.extui %33 : i1 to i32
    %c0_i32_27 = arith.constant 0 : i32
    %35 = arith.cmpi ne, %34, %c0_i32_27 : i32
    scf.if %35 {
      %c0_28 = arith.constant 0 : index
      %c0_29 = arith.constant 0 : index
      %36 = vector.load %arg13[%c0_28, %c0_29] : memref<8x1xf32, #tpu.memory_space<vmem>>, vector<8x1xf32>
      %37 = tpu.reciprocal %36 {approx = true} : vector<8x1xf32> -> vector<8x1xf32>
      %38 = arith.mulf %36, %37 : vector<8x1xf32>
      %cst_30 = arith.constant 2.000000e+00 : f32
      %39 = vector.broadcast %cst_30 : f32 to vector<8x1xf32>
      %40 = arith.subf %39, %38 : vector<8x1xf32>
      %41 = arith.mulf %37, %40 : vector<8x1xf32>
      %c0_31 = arith.constant 0 : index
      %c0_32 = arith.constant 0 : index
      %42 = vector.load %arg14[%c0_31, %c0_32] : memref<8x32xf32, #tpu.memory_space<vmem>>, vector<8x32xf32>
      %43 = vector.broadcast %41 : vector<8x1xf32> to vector<8x32xf32>
      %44 = arith.mulf %42, %43 : vector<8x32xf32>
      %c0_33 = arith.constant 0 : index
      %c0_34 = arith.constant 0 : index
      %45 = vector.load %arg8[%c0_33, %c0_34] : memref<32x32xf32, #tpu.memory_space<vmem>>, vector<32x32xf32>
      %cst_35 = arith.constant dense<0.000000e+00> : vector<8x32xf32>
      %46 = tpu.matmul %44, %45, %cst_35 {dimension_numbers = #tpu.dot_dimension_numbers<[1], [0], [0], [1], [0, 0, 1, 1], [], []>} : vector<8x32xf32>, vector<32x32xf32>, vector<8x32xf32> -> vector<8x32xf32>
      %c0_36 = arith.constant 0 : index
      %c0_37 = arith.constant 0 : index
      %47 = vector.load %arg9[%c0_36, %c0_37] : memref<1x32xf32, #tpu.memory_space<vmem>>, vector<1x32xf32>
      %48 = vector.broadcast %47 : vector<1x32xf32> to vector<8x32xf32>
      %49 = arith.addf %46, %48 : vector<8x32xf32>
      %c0_38 = arith.constant 0 : index
      %c0_39 = arith.constant 0 : index
      %c0_40 = arith.constant 0 : index
      %50 = vector.load %arg10[%c0_38, %c0_39, %c0_40] : memref<1x8x32xf32, #tpu.memory_space<vmem>>, vector<1x8x32xf32>
      %51 = vector.shape_cast %50 : vector<1x8x32xf32> to vector<8x32xf32>
      %52 = vector.shape_cast %49 : vector<8x32xf32> to vector<1x8x32xf32>
      tpu.vector_store %arg10[%c0_38, %c0_39, %c0_40], %52 {strides = array<i32>} : memref<1x8x32xf32, #tpu.memory_space<vmem>>, vector<1x8x32xf32>,
    } else {
    }
    return
  }
  func.func @transform_0(%arg0: i32, %arg1: i32, %arg2: i32) -> (i32, i32, i32) {
    %c0_i32 = arith.constant 0 : i32
    %c0_i32_0 = arith.constant 0 : i32
    return %arg0, %arg1, %c0_i32 : i32, i32, i32
  }
  func.func @transform_1(%arg0: i32, %arg1: i32, %arg2: i32) -> (i32, i32, i32) {
    %c0_i32 = arith.constant 0 : i32
    %c0_i32_0 = arith.constant 0 : i32
    return %arg0, %arg2, %c0_i32 : i32, i32, i32
  }
  func.func @transform_2(%arg0: i32, %arg1: i32, %arg2: i32) -> (i32, i32) {
    %c0_i32 = arith.constant 0 : i32
    %c0_i32_0 = arith.constant 0 : i32
    %c0_i32_1 = arith.constant 0 : i32
    return %c0_i32, %c0_i32_0 : i32, i32
  }
  func.func @transform_3(%arg0: i32, %arg1: i32, %arg2: i32) -> (i32, i32) {
    %c0_i32 = arith.constant 0 : i32
    %c0_i32_0 = arith.constant 0 : i32
    %c0_i32_1 = arith.constant 0 : i32
    return %c0_i32, %c0_i32_0 : i32, i32
  }
  func.func @transform_4(%arg0: i32, %arg1: i32, %arg2: i32) -> (i32, i32) {
    %c0_i32 = arith.constant 0 : i32
    %c0_i32_0 = arith.constant 0 : i32
    %c0_i32_1 = arith.constant 0 : i32
    return %c0_i32, %c0_i32_0 : i32, i32
  }
  func.func @transform_5(%arg0: i32, %arg1: i32, %arg2: i32) -> (i32, i32) {
    %c0_i32 = arith.constant 0 : i32
    %c0_i32_0 = arith.constant 0 : i32
    %c0_i32_1 = arith.constant 0 : i32
    return %c0_i32, %c0_i32_0 : i32, i32
  }
  func.func @transform_6(%arg0: i32, %arg1: i32, %arg2: i32) -> (i32, i32) {
    %c0_i32 = arith.constant 0 : i32
    %c0_i32_0 = arith.constant 0 : i32
    %c0_i32_1 = arith.constant 0 : i32
    return %c0_i32, %c0_i32_0 : i32, i32
  }
  func.func @transform_7(%arg0: i32, %arg1: i32, %arg2: i32) -> (i32, i32, i32) {
    %c0_i32 = arith.constant 0 : i32
    %c0_i32_0 = arith.constant 0 : i32
    return %arg0, %arg1, %c0_i32 : i32, i32, i32
  }
}

</mosaic_0001>

<bundles_post_ra>
// kernel: tpu_custom_call.1
= control target key start
LH: loop header
LB: loop body
LE: loop exit
PB: predicated region body
PF: predicated region fallthrough
CT: control target
= control target key end

     0   :  { %s1940_s0 = inlined_call_operand.hbm [shape: f32[2,8,32], index: 0, kind: input, shape index: {}]   ;;  %s1941_s1 = inlined_call_operand.hbm [shape: f32[2,8,32], index: 1, kind: input, shape index: {}]   ;;  %s1942_s2 = inlined_call_operand.hbm [shape: f32[32,32], index: 2, kind: input, shape index: {}]   ;;  %s1943_s3 = inlined_call_operand.hbm [shape: f32[32,32], index: 3, kind: input, shape index: {}]   ;;  %s1944_s4 = inlined_call_operand.hbm [shape: f32[32,32], index: 4, kind: input, shape index: {}]   ;;  %s1945_s5 = inlined_call_operand.hbm [shape: f32[32,32], index: 5, kind: input, shape index: {}]   ;;  %s1946_s6 = inlined_call_operand.vmem [shape: f32[1,32], index: 6, kind: input, shape index: {}]   ;;  %s1947_s7 = inlined_call_operand.hbm [shape: f32[2,8,32], index: 7, kind: output, shape index: {}]  }
   0x1   :  { %1949 = sst [smem:[#allocation24_spill]] %s1940_s0 }
   0x2   :  { %1950 = sst [smem:[#allocation25_spill]] %s1942_s2 }
   0x3   :  { %1951 = sst [smem:[#allocation26_spill]] %s1943_s3 }
   0x4   :  { %1952 = sst [smem:[#allocation27_spill]] %s1944_s4 }
   0x5   :  { %1953 = sst [smem:[#allocation28_spill]] %s1945_s5 }
   0x6   :  { %12 = vsyncpa [#allocation7], 0 }
   0x7   :  { %14 = vsyncpa [#allocation7 + $0x1], 0 }
   0x8   :  { %15 = vsyncpa [#allocation10], 0 }
   0x9   :  { %17 = vsyncpa [#allocation10 + $0x1], 0 }
   0xa   :  { %18 = vsyncpa [#allocation13], 0 }
   0xb   :  { %19 = vsyncpa [#allocation16], 0 }
   0xc   :  { %20 = vsyncpa [#allocation8], 0 }
   0xd   :  { %22 = vsyncpa [#allocation8 + $0x1], 0  ;;  %s1645_s24 = smov 0   ;;  %s1647_s25 = smov 0  }
   0xe   :  { %s1649_s26 = smov 0   ;;  %s1651_s27 = smov 0  }
   0xf   :  { %s1653_s28 = smov 0   ;;  %s1655_s29 = smov 0  }
  0x10 LB: > { %s1676_s30 = sadd.s32 4294967295, %s1590_s29   ;;  %p1104_p0 = scmp.ge.s32.totalorder %s1590_s29, 1  ;;  %s1590_s29 = sphi %s1655_s29, %s28_s29   ;;  %s1586_s28 = sphi %s1653_s28, %s1977_s28   ;;  %s1582_s27 = sphi %s1651_s27, %s1976_s27   ;;  %s1578_s26 = sphi %s1649_s26, %s1975_s26   ;;  %s1574_s25 = sphi %s1647_s25, %s1974_s25   ;;  %s1570_s24 = sphi %s1645_s24, %s1973_s24  }
  0x11   : > { %p1948_p1 = scmp.eq.s32.totalorder %s1676_s30, 0  ;;  %p241_p2 = scmp.lt.s32.totalorder %s1590_s29, 3 }
  0x12   : > { %s1592_s9 = smov [#allocation11]   ;;  %s1593_s12 = smov [#allocation12]  }
  0x13   : > { %p1681_p3 = pnand %p1104_p0, %p241_p2  ;;  %s253_s10 = sshll.u32 %s1592_s9, 4  ;;  %s254_s10 = int_to_ptr.vmem [resolvable:$true] %s253_s10 }
  0x14   : > { %s266_s13 = sshll.u32 %s1593_s12, 4  ;;  %s1594_s14 = smov [#allocation14]   ;;  %s267_s13 = int_to_ptr.vmem [resolvable:$true] %s266_s13 }
  0x15   : > { %p1234_p4 = pneg %p1681_p3  ;;  %s279_s15 = sshll.u32 %s1594_s14, 4  ;;  %s280_s15 = int_to_ptr.vmem [resolvable:$true] %s279_s15 }
  0x16   : > { %s1345_s16 = scalar_lea.vmem %s254_s10, 512  ;;  %p1353_p11 = scmp.lt.s32.totalorder %s254_s10, %s254_s10 }
  0x17   : > { %p1690_p6 = pnand %p1234_p4, %p1948_p1  ;;  %p1346_p8 = scmp.ne.s32.totalorder %s254_s10, %s1345_s16 }
  0x18   : > { %p1354_p12 = scmp.lt.s32.totalorder %s1345_s16, %s1345_s16 }
  0x19   : > { %p1336_p7 = pneg %p1690_p6 }
  0x1a   : > { %p1355_p13 = por %p1354_p12, %p1353_p11 }
  0x1b   : > { %p1348_p9 = pnand %p1346_p8, %p1336_p7 }
  0x1d   : > { %p1349_p10 = pneg %p1348_p9 }
  0x1f   : > { %p1356_p0 = pnand %p1355_p13, %p1349_p10 }
  0x21   : > { %1359 = shalt.err (!%p1356_p0)
}
  0x22   : > { %s1595_s17 = smov 128   ;;  %s1596_s18 = smov 8  }
  0x23   : > { %s1956_s2 = sld [smem:[#allocation25_spill]]  ;;  %s1371_s21 = scalar_lea.vmem %s267_s13, 512 }
  0x24   : > { %p1372_p2 = scmp.ne.s32.totalorder %s267_s13, %s1371_s21  ;;  %p1379_p9 = scmp.lt.s32.totalorder %s267_s13, %s267_s13 }
  0x25   : > { %p1380_p10 = scmp.lt.s32.totalorder %s1371_s21, %s1371_s21 }
  0x26   : > { %p1374_p4 = pnand %p1372_p2, %p1336_p7 }
  0x27   : > { %p1381_p11 = por %p1380_p10, %p1379_p9 }
  0x28   : > { %p1375_p8 = pneg %p1374_p4 }
  0x29   : > { %1237 = dma.hbm_to_vmem [thread:$0]  (!%p1690_p6), %s1956_s2, 512, %s254_s10, [#allocation10], %s1595_s17, %s1595_s17, %s1596_s18  }
  0x2a   : > { %p1382_p12 = pnand %p1381_p11, %p1375_p8 }
  0x2c   : > { %1385 = shalt.err (!%p1382_p12)
}
  0x2d   : > { %s1957_s3 = sld [smem:[#allocation26_spill]]  ;;  %s1397_s9 = scalar_lea.vmem %s280_s15, 512 }
  0x2e   : > { %p1398_p13 = scmp.ne.s32.totalorder %s280_s15, %s1397_s9  ;;  %p1405_p4 = scmp.lt.s32.totalorder %s280_s15, %s280_s15 }
  0x2f   : > { %p1406_p8 = scmp.lt.s32.totalorder %s1397_s9, %s1397_s9 }
  0x30   : > { %p1400_p0 = pnand %p1398_p13, %p1336_p7 }
  0x31   : > { %p1407_p9 = por %p1406_p8, %p1405_p4 }
  0x32   : > { %p1401_p2 = pneg %p1400_p0 }
  0x33   : > { %1240 = dma.hbm_to_vmem [thread:$0]  (!%p1690_p6), %s1957_s3, 512, %s267_s13, [#allocation13], %s1595_s17, %s1595_s17, %s1596_s18  }
  0x34   : > { %p1408_p10 = pnand %p1407_p9, %p1401_p2 }
  0x36   : > { %1411 = shalt.err (!%p1408_p10)
}
  0x37   : > { %s1958_s4 = sld [smem:[#allocation27_spill]]  ;;  %s1597_s13 = smov [#allocation15]  }
  0x38   : > { %s292_s14 = sshll.u32 %s1597_s13, 4  ;;  %s293_s14 = int_to_ptr.vmem [resolvable:$true] %s292_s14 }
  0x39   : > { %s1423_s16 = scalar_lea.vmem %s293_s14, 512  ;;  %p1431_p0 = scmp.lt.s32.totalorder %s293_s14, %s293_s14 }
  0x3a   : > { %p1424_p11 = scmp.ne.s32.totalorder %s293_s14, %s1423_s16  ;;  %p1432_p2 = scmp.lt.s32.totalorder %s1423_s16, %s1423_s16 }
  0x3c   : > { %p1426_p12 = pnand %p1424_p11, %p1336_p7  ;;  %p1433_p4 = por %p1432_p2, %p1431_p0 }
  0x3d   : > { %1243 = dma.hbm_to_vmem [thread:$0]  (!%p1690_p6), %s1958_s4, 512, %s280_s15, [#allocation13], %s1595_s17, %s1595_s17, %s1596_s18  }
  0x3e   : > { %p1427_p13 = pneg %p1426_p12 }
  0x40   : > { %p1434_p8 = pnand %p1433_p4, %p1427_p13 }
  0x42   : > { %1437 = shalt.err (!%p1434_p8)
}
  0x43   : > { %s1959_s5 = sld [smem:[#allocation28_spill]]  ;;  %s1103_s11 = sadd.s32 4294967294, %s1590_s29  }
  0x44   : > { %s47_s20 = sadd.s32 1, %s1586_s28  ;;  %s56_s21 = sadd.s32 1, %s1578_s26 }
  0x45   : > { %p49_p7 = scmp.ge.s32.totalorder %s47_s20, 2  ;;  %p63_p9 = scmp.ne.s32.totalorder %s1578_s26, %s1574_s25 }
  0x46   : > { %p64_p10 = scmp.eq.s32.totalorder %s1590_s29, 0  ;;  %p69_p12 = scmp.ne.s32.totalorder %s1574_s25, %s1570_s24 }
  0x47   : > { %s1979_s20 = smov (%p49_p7, %s47_s20), 0  ;;  %p234_p4 = scmp.eq.s32.totalorder %s1103_s11, 1 }
  0x48   : > { %p1748_p11 = por %p64_p10, %p63_p9  ;;  %p1759_p0 = por %p1948_p1, %p69_p12 }
  0x49   : > { %1246 = dma.hbm_to_vmem [thread:$0]  (!%p1690_p6), %s1959_s5, 512, %s293_s14, [#allocation16], %s1595_s17, %s1595_s17, %s1596_s18  }
  0x4a   : > { %s51_s17 = ssub.s32 %s1586_s28, %s1979_s20  ;;  %p228_p6 = scmp.eq.s32.totalorder %s1676_s30, 1 }
  0x4b   : > { %p54_p13 = scmp.eq.s32.totalorder %s51_s17, 0  ;;  %p1770_p8 = por %p234_p4, %p69_p12 }
  0x4c   : > { %p1763_p2 = por %p228_p6, %p63_p9  ;;  %p1262_p7 = scmp.lt.s32.totalorder %s1590_s29, 2 }
  0x4d   : > { %s1768_s9 = scalar_select %p54_p13, %s1578_s26, %s56_s21  }
  0x4e   : > { %s309_s12 = sand.u32 1, %s1578_s26   ;;  %s1111_s13 = sshll.u32 %s1586_s28, 7 }
  0x4f   : > { %s1110_s14 = sshll.u32 %s309_s12, 3  ;;  %s1964_s0 = sld [smem:[#allocation24_spill]] }
  0x50   : > { %s313_s17 = scalar_lea.vmem [#allocation6], %s1110_s14  ;;  %p1782_p9 = pnand %p1262_p7, %p1748_p11 }
  0x51   : > { %s321_s2 = sshll.u32 %s313_s17, 4  ;;  %s1789_s4 = scalar_lea.hbm %s1941_s1, %s1111_s13  ;;  %s322_s2 = int_to_ptr.vmem [resolvable:$true] %s321_s2 }
  0x52   : > { %s310_s5 = scalar_lea.sflag [#allocation7], %s309_s12  ;;  %p1440_p10 = pneg %p1782_p9 }
  0x53   : > { %s1451_s16 = scalar_lea.vmem %s322_s2, 128  ;;  %s1598_s22 = smov [#allocation6]  }
  0x54   : > { %p1452_p12 = scmp.ne.s32.totalorder %s322_s2, %s1451_s16  ;;  %s1456_s15 = sshll.u32 %s1598_s22, 4  ;;  %s1457_s15 = int_to_ptr.vmem [resolvable:$false] %s1456_s15 }
  0x55   : > { %s319_s19 = scalar_lea.hbm %s1964_s0, %s1111_s13  ;;  %s1458_s17 = scalar_lea.vmem %s1457_s15, 256 }
  0x56   : > { %p1454_p6 = pnand %p1452_p12, %p1440_p10  ;;  %p1459_p13 = scmp.lt.s32.totalorder %s322_s2, %s1457_s15 }
  0x57   : > { %p1460_p4 = scmp.lt.s32.totalorder %s1458_s17, %s1451_s16 }
  0x58   : > { %p1455_p11 = pneg %p1454_p6 }
  0x59   : > { %p1461_p7 = por %p1460_p4, %p1459_p13 }
  0x5b   : > { %p1462_p5 = pnand %p1461_p7, %p1455_p11 }
  0x5d   : > { %1465 = shalt.err (!%p1462_p5)
}
  0x5e   : > { %1250 = dma.hbm_to_vmem [thread:$0]  (!%p1782_p9), %s319_s19, 128, %s322_s2, %s310_s5  }
  0x5f   : > { %s328_s12 = sand.u32 1, %s1590_s29   ;;  %s332_s13 = scalar_lea.vmem [#allocation9], %s1110_s14 }
  0x60   : > { %s340_s11 = sshll.u32 %s332_s13, 4  ;;  %s329_s21 = scalar_lea.sflag [#allocation10], %s328_s12  ;;  %s341_s11 = int_to_ptr.vmem [resolvable:$true] %s340_s11 }
  0x61   : > { %s1479_s0 = scalar_lea.vmem %s341_s11, 128  ;;  %s1599_s16 = smov [#allocation9]  }
  0x62   : > { %p1480_p12 = scmp.ne.s32.totalorder %s341_s11, %s1479_s0  ;;  %s1484_s22 = sshll.u32 %s1599_s16, 4  ;;  %s1485_s22 = int_to_ptr.vmem [resolvable:$false] %s1484_s22 }
  0x63   : > { %s1486_s15 = scalar_lea.vmem %s1485_s22, 256  ;;  %p1487_p5 = scmp.lt.s32.totalorder %s341_s11, %s1485_s22 }
  0x64   : > { %p1482_p6 = pnand %p1480_p12, %p1440_p10  ;;  %p1488_p11 = scmp.lt.s32.totalorder %s1486_s15, %s1479_s0 }
  0x66   : > { %p1483_p1 = pneg %p1482_p6  ;;  %p1489_p13 = por %p1488_p11, %p1487_p5 }
  0x68   : > { %p1490_p4 = pnand %p1489_p13, %p1483_p1 }
  0x6a   : > { %1493 = shalt.err (!%p1490_p4)
}
  0x6b   : > { %1253 = dma.hbm_to_vmem [thread:$0]  (!%p1782_p9), %s1789_s4, 128, %s341_s11, %s329_s21  }
  0x6c   : > { %349 = sbr.rel (%p1681_p3) target bundleno = 1316 (0x524), region = 48  ;;  %s1808_s2 = sand.u32 (!%p1681_p3), 1, %s1574_s25  }
  0x6d   : > { %s1811_s5 = sshll.u32 (!%p1681_p3), %s1808_s2, 3  ;;  %s352_s0 = scalar_lea.sflag (!%p1681_p3), [#allocation7], %s1808_s2 }
  0x6e   : > { %s355_s14 = scalar_lea.vmem (!%p1681_p3), [#allocation6], %s1811_s5 }
  0x71   : > { %1545 = dma.done.wait (%p1759_p0), %s352_s0, 128  }
  0x72   : > { %1547 = vsyncadd (%p1759_p0), %s352_s0, 4294967168  ;;  %s360_s3 = sand.u32 1, %s1676_s30   ;;  %s364_s8 = scalar_lea.vmem [#allocation9], %s1811_s5 }
  0x73   : > { %s361_s4 = scalar_lea.sflag [#allocation10], %s360_s3 }
  0x74   : > { %1549 = dma.done.wait (%p1759_p0), %s361_s4, 128  }
  0x75   : > { %1551 = vsyncadd (%p1759_p0), %s361_s4, 4294967168  ;;  %p1966_p1 = scmp.eq.s32.totalorder %s1676_s30, 0 }
  0x77   : > { %1553 = dma.done.wait (%p1966_p1), [#allocation10], 512   ;;  %p1967_p3 = pmov %p1966_p1 }
  0x78   : > { %p1968_p9 = pmov %p1966_p1 }
  0x79   : > { %1555 = vsyncadd (%p1967_p3), [#allocation10], 4294966784 }
  0x7a   : > { %1557 = dma.done.wait (%p1968_p9), [#allocation13], 1024   ;;  %p1969_p10 = pmov %p1966_p1 }
  0x7b   : > { %p1970_p7 = pmov %p1966_p1 }
  0x7c   : > { %1559 = vsyncadd (%p1969_p10), [#allocation13], 4294966272 }
  0x7d   : > { %1561 = dma.done.wait (%p1970_p7), [#allocation16], 512   ;;  %p1971_p12 = pmov %p1966_p1 }
  0x7e   : > { %vm425_vm0 = vcmask 261120   ;;  %v1600_v0 = vmov 0.0   ;;  %vm1601_vm1 = vmmov 0   ;;  %v424_v1 = vld [vmem:[#allocation11 + $0x18] sm:$0xff]  ;;  %v423_v2 = vld [vmem:[#allocation11 + $0x10] sm:$0xff]  ;;  %v422_v5 = vld [vmem:[#allocation11 + $0x8] sm:$0xff] }
  0x7f   : > { %1563 = vsyncadd (%p1971_p12), [#allocation16], 4294966784  ;;  %1158 = vmatprep.subr.mxu0 %v1600_v0  ;;  %1169 = vmatprep.subr.mxu1 %v1600_v0  ;;  %503 = vst.msk [vmem:[#allocation5] sm:$0xff] %vm425_vm0, %v1600_v0  ;;  %v508_v3 = vld [vmem:[#allocation12 + $0x18] sm:$0xff]  ;;  %v507_v4 = vld [vmem:[#allocation12 + $0x10] sm:$0xff]  ;;  %vm500_vm2 = vcmask 7168  }
  0x80   : > { %1166 = vmatprep.mubr.msk.f32.mxu0 %vm1601_vm1, %v1600_v0  ;;  %1177 = vmatprep.mubr.msk.f32.mxu1 %vm1601_vm1, %v1600_v0  ;;  %v506_v6 = vld [vmem:[#allocation12 + $0x8] sm:$0xff]  ;;  %v421_v7 = vld [vmem:[#allocation11] sm:$0xff]  ;;  %v504_v10 = vld [vmem:[%s364_s8] sm:$0xff]  ;;  %v1602_v18 = vmov -inf   ;;  %502 = vst.msk [vmem:[#allocation4] sm:$0xff] %vm500_vm2, %v1600_v0  ;;  %vm735_vm3 = vcmask 64512  }
  0x81   : > { %1159 = vmatpush3.msra.mxu0 %v424_v1  ;;  %1170 = vmatpush3.msra.mxu1 %v508_v3  ;;  %v505_v8 = vld [vmem:[#allocation12] sm:$0xff]  ;;  %v586_v16 = vld [vmem:[#allocation14 + $0x18] sm:$0xff]  ;;  %v585_v17 = vld [vmem:[#allocation14 + $0x10] sm:$0xff]  ;;  %501 = vst.msk [vmem:[#allocation3] sm:$0xff] %vm500_vm2, %v1602_v18  ;;  %v1603_v24 = vmov 0   ;;  %s1131_s19 = sshll.u32 %s1582_s27, 7 }
  0x82   : > { %1160 = vmatprep.subr.mxu0 %v1600_v0  ;;  %1171 = vmatprep.subr.mxu1 %v1600_v0  ;;  %v420_v9 = vld [vmem:[%s355_s14] sm:$0xff]  ;;  %v860_v38 = vld [vmem:[#allocation15 + $0x18] sm:$0xff]  ;;  %v859_v39 = vld [vmem:[#allocation15 + $0x10] sm:$0xff]  ;;  %s415_s17 = scalar_lea.vmem [#allocation17], %s1811_s5  ;;  %s1897_s21 = scalar_lea.hbm %s1947_s7, %s1131_s19 }
  0x83   : > { %1161 = vmatpush3.msra.mxu0 %v423_v2  ;;  %1172 = vmatpush3.msra.mxu1 %v507_v4  ;;  %v584_v19 = vld [vmem:[#allocation14 + $0x8] sm:$0xff]  ;;  %v583_v20 = vld [vmem:[#allocation14] sm:$0xff]  ;;  %s957_s12 = sshll.u32 %s415_s17, 4  ;;  %s943_s16 = scalar_lea.sflag [#allocation8], %s1808_s2  ;;  %s958_s12 = int_to_ptr.vmem [resolvable:$true] %s957_s12 }
  0x84   : > { %1162 = vmatprep.subr.mxu0 %v1600_v0  ;;  %1173 = vmatprep.subr.mxu1 %v1600_v0  ;;  %v858_v40 = vld [vmem:[#allocation15 + $0x8] sm:$0xff]  ;;  %v857_v49 = vld [vmem:[#allocation15] sm:$0xff]  ;;  %s1494_s22 = scalar_lea.vmem %s958_s12, 128  ;;  %s1604_s27 = smov [#allocation17]  }
  0x85   : > { %1163 = vmatpush3.msra.mxu0 %v422_v5  ;;  %1174 = vmatpush3.msra.mxu1 %v506_v6  ;;  %v1128_v60 = vld [vmem:[%s1946_s6] ss:$0 sm:$0xff]  ;;  %p1495_p0 = scmp.ne.s32.totalorder %s958_s12, %s1494_s22  ;;  %s1498_s15 = sshll.u32 %s1604_s27, 4  ;;  %s1499_s15 = int_to_ptr.vmem [resolvable:$false] %s1498_s15 }
  0x86   : > { %1164 = vmatprep.subr.mxu0 %v1600_v0  ;;  %1175 = vmatprep.subr.mxu1 %v1600_v0  ;;  %v759_v51 = vld [vmem:[#allocation5] sm:$0xff]  ;;  %s1500_s5 = scalar_lea.vmem %s1499_s15, 256  ;;  %p1501_p11 = scmp.lt.s32.totalorder %s958_s12, %s1499_s15 }
  0x87   : > { %1165 = vmatpush3.msra.mxu0 %v421_v7  ;;  %1176 = vmatpush3.msra.mxu1 %v505_v8  ;;  %v751_v41 = vld [vmem:[#allocation4] sm:$0xff]  ;;  %p1496_p6 = pnand %p1495_p0, %p1763_p2  ;;  %p1502_p13 = scmp.lt.s32.totalorder %s1500_s5, %s1494_s22 }
  0x88   : > { %1167 = vmatmul.mubr.msk.f32.vlgmr.msra.gmra.mxu0 %vm425_vm0, %v420_v9  ;;  %1178 = vmatmul.mubr.msk.f32.vlgmr.msra.gmra.mxu1 %vm425_vm0, %v504_v10  ;;  %v734_v25 = vld [vmem:[#allocation3] sm:$0xff] }
  0x89   : > { %1191 = vmatprep.subr.mxu1 %v1600_v0  ;;  %1193 = vmatprep.mubr.msk.f32.mxu1 %vm1601_vm1, %v1600_v0  ;;  %p1497_p5 = pneg %p1496_p6  ;;  %p1503_p4 = por %p1502_p13, %p1501_p11 }
  0x8a   : > { %1180 = vmatprep.subr.mxu0 %v1600_v0  ;;  %1188 = vmatprep.mubr.msk.f32.mxu0 %vm1601_vm1, %v1600_v0 }
  0x8b   : > { %1181 = vmatpush3.msra.mxu0 %v586_v16  ;;  %1326 = vset.pattern.permute.xlu0 %v1603_v24  ;;  %p1504_p1 = pnand %p1503_p4, %p1497_p5 }
  0x8c   : > { %1182 = vmatprep.subr.mxu0 %v1600_v0  ;;  %1327 = vset.pattern.permute.xlu1 %v1603_v24 }
  0x8d   : > { %1183 = vmatpush3.msra.mxu0 %v585_v17 }
  0x8e   : > { %1184 = vmatprep.subr.mxu0 %v1600_v0 }
  0x8f   : > { %1185 = vmatpush3.msra.mxu0 %v584_v19 }
  0x90   : > { %1186 = vmatprep.subr.mxu0 %v1600_v0 }
  0x91   : > { %1187 = vmatpush3.msra.mxu0 %v583_v20 }
  0x92   : > { %1189 = vmatmul.mubr.msk.f32.vlgmr.msra.gmra.mxu0 %vm425_vm0, %v504_v10  ;;  %1201 = vmatprep.subr.mxu0 %v1600_v0 }
  0x93   : > { %1209 = vmatprep.mubr.msk.f32.mxu0 %vm1601_vm1, %v1600_v0  ;;  %1202 = vmatpush3.msra.mxu0 %v860_v38 }
  0x94   : > { %1203 = vmatprep.subr.mxu0 %v1600_v0 }
  0x95   : > { %1204 = vmatpush3.msra.mxu0 %v859_v39 }
  0x96   : > { %1205 = vmatprep.subr.mxu0 %v1600_v0 }
  0x97   : > { %1206 = vmatpush3.msra.mxu0 %v858_v40 }
  0x98   : > { %1207 = vmatprep.subr.mxu0 %v1600_v0 }
  0x99   : > { %1208 = vmatpush3.msra.mxu0 %v857_v49 }
 0x148   : > { %v495_v11 = vpop.f32.mrf.mxu0  ;;  %v579_v12 = vpop.f32.mrf.mxu1 }
 0x149   : > { %499 = vst.msk [vmem:[#allocation2] sm:$0xff] %vm425_vm0, %v495_v11  ;;  %1192 = vmatpush3.xpose.msk.msra.mxu1 %vm425_vm0, %v579_v12 }
 0x14a   : > { %v1168_v13 = vpop.f32.mrf.mxu0  ;;  %v1179_v14 = vpop.f32.mrf.mxu1  ;;  %1196 = vmatprep.subr.mxu1 %v1600_v0 }
 0x150   : > { %v657_v15 = vld [vmem:[#allocation2] sm:$0xff] }
 0x151   : > { %1194 = vmatmul.mubr.msk.f32.vlgmr.msra.gmra.mxu1 %vm425_vm0, %v657_v15 }
 0x152   : > { %1198 = vmatprep.mubr.msk.f32.mxu1 %vm1601_vm1, %v1600_v0  ;;  %v653_v29 = vpop.f32.mrf.mxu0 }
 0x153   : > { %1197 = vmatpush3.msra.mxu1 %v653_v29 }
 0x154   : > { %v1190_v30 = vpop.f32.mrf.mxu0 }
 0x211   : > { %v730_v21 = vpop.f32.mrf.mxu1 }
 0x212   : > { %v736_v22 = vsel %vm735_vm3, %v730_v21, -inf }
 0x213   : > { %737 = vmax.xlane.f32.xlu0 %v736_v22  ;;  %v1195_v23 = vpop.f32.mrf.mxu1 }
 0x29c   : > { %v738_v26 = vpop.xlane.xlu0 %737 }
 0x29d   : > { %v739_v27 = vmax.f32 %v734_v25, %v738_v26 }
 0x29f   : > { %v740_v28 = vsub.f32 %v734_v25, %v739_v27  ;;  %841 = vst.msk [vmem:[#allocation3] sm:$0xff] %vm500_vm2, %v739_v27  ;;  %745 = vperm.xlu0 %1326, %v739_v27  }
 0x2a1   : > { %v741_v35 = vmul.f32 1.442695, %v740_v28 }
 0x31a   : > { %v746_v31 = vpop.permute.xlu0 %745 }
 0x31b   : > { %v748_v32 = vsub.f32 %v730_v21, %v746_v31 }
 0x31d   : > { %v749_v33 = vmul.f32 1.442695, %v748_v32 }
 0x31f   : > { %1328 = vpow2.f32 %v749_v33 }
 0x320   : > { %1330 = vpow2.f32 %v741_v35 }
 0x32c   : > { %v1329_v34 = vpop.eup %1328 }
 0x32d   : > { %1199 = vmatmul.mubr.msk.f32.vlgmr.msra.gmra.mxu1 %vm735_vm3, %v1329_v34  ;;  %v753_v36 = vsel %vm735_vm3, %v1329_v34, 0.0  ;;  %v1331_v37 = vpop.eup %1330 }
 0x32e   : > { %754 = vadd.xlane.f32.xlu1 %v753_v36  ;;  %v752_v42 = vmul.f32 %v1331_v37, %v751_v41 }
 0x33f   : > { %762 = vperm.xlu1 %1327, %v1331_v37  }
 0x3b7   : > { %v755_v43 = vpop.xlane.xlu1 %754 }
 0x3b8   : > { %v756_v44 = vadd.f32 %v755_v43, %v752_v42 }
 0x3ba   : > { %758 = vst.msk [vmem:[#allocation4] sm:$0xff] %vm500_vm2, %v756_v44 }
 0x3bb   : > { %v763_v52 = vpop.permute.xlu1 %762 }
 0x3bc   : > { %v765_v53 = vmul.f32 %v763_v52, %v759_v51 }
 0x3c1   : > { %v845_v45 = vld [vmem:[#allocation4] sm:$0xff] }
 0x3c2   : > { %1332 = vrcp.f32 %v845_v45 }
 0x3cf   : > { %v1333_v46 = vpop.eup %1332 }
 0x3d0   : > { %v847_v47 = vmul.f32 %v1333_v46, %v845_v45 }
 0x3d2   : > { %v848_v48 = vsub.f32 2.0, %v847_v47 }
 0x3d4   : > { %v849_v50 = vmul.f32 %v1333_v46, %v848_v48 }
 0x3d6   : > { %853 = vperm.xlu1 %1327, %v849_v50  }
 0x3ed   : > { %v835_v54 = vpop.f32.mrf.mxu1 }
 0x3ee   : > { %v839_v55 = vadd.f32 %v835_v54, %v765_v53 }
 0x3ef   : > { %v1200_v56 = vpop.f32.mrf.mxu1 }
 0x3f0   : > { %840 = vst.msk [vmem:[#allocation5] sm:$0xff] %vm425_vm0, %v839_v55 }
 0x3f7   : > { %v850_v58 = vld [vmem:[#allocation5] sm:$0xff] }
 0x451   : > { %v854_v57 = vpop.permute.xlu1 %853 }
 0x452   : > { %v856_v59 = vmul.f32 %v854_v57, %v850_v58 }
 0x454   : > { %1210 = vmatmul.mubr.msk.f32.vlgmr.msra.gmra.mxu0 %vm425_vm0, %v856_v59 }
 0x514   : > { %v937_v61 = vpop.f32.mrf.mxu0 }
 0x515   : > { %v938_v62 = vadd.f32 %v1128_v60, %v937_v61 }
 0x516   : > { %v1211_v63 = vpop.f32.mrf.mxu0 }
 0x517   : > { %941 = vst.msk [vmem:[%s415_s17] sm:$0xff] %vm425_vm0, %v938_v62 }
 0x518   : > { %1507 = shalt.err (!%p1504_p1)
}
 0x519   : > { %s1508_s0 = scalar_lea.hbm %s1897_s21, 128  ;;  %s1512_s3 = scalar_lea.hbm %s1947_s7, 256 }
 0x51a   : > { %p1509_p3 = scmp.ne.s32.totalorder %s1897_s21, %s1508_s0  ;;  %p1513_p7 = scmp.lt.s32.totalorder %s1897_s21, %s1947_s7 }
 0x51b   : > { %p1514_p12 = scmp.lt.s32.totalorder %s1512_s3, %s1508_s0 }
 0x51c   : > { %p1510_p9 = pnand %p1509_p3, %p1763_p2 }
 0x51d   : > { %p1515_p0 = por %p1514_p12, %p1513_p7 }
 0x51e   : > { %p1511_p10 = pneg %p1510_p9 }
 0x520   : > { %p1516_p6 = pnand %p1515_p0, %p1511_p10 }
 0x522   : > { %1519 = shalt.err (!%p1516_p6)
}
 0x523   : > { %1232 = dma.vmem_to_hbm [thread:$0]  (%p1763_p2), %s958_s12, 128, %s1897_s21, %s943_s16  }
 0x524 PF: > { %s969_s30 = sand.u32 1, %s1570_s24   ;;  %p1972_p5 = scmp.ge.s32.totalorder %s1590_s29, 2 }
 0x525   : > { %s970_s18 = scalar_lea.sflag [#allocation8], %s969_s30 }
 0x526   : > { %p1255_p11 = pnand %p1972_p5, %p1770_p8 }
 0x528   : > { %p1256_p13 = pneg %p1255_p11 }
 0x52a   : > { %1565 = dma.done.wait (%p1256_p13), %s970_s18, 128  }
 0x52b   : > { %1567 = vsyncadd (%p1256_p13), %s970_s18, 4294967168  ;;  %s28_s29 = sadd.s32 1, %s1590_s29   ;;  %s1973_s24 = smov %s1574_s25 }
 0x52c   : > { %p25_p4 = scmp.ge.s32.totalorder %s28_s29, 4   ;;  %s1974_s25 = smov %s1578_s26 }
 0x52d   : > { %s1975_s26 = smov %s1768_s9  ;;  %s1976_s27 = smov %s1586_s28 }
 0x52e   : > { %s1977_s28 = smov %s1979_s20  ;;  %27 = sbr.rel (!%p25_p4) target bundleno = 16 (0x10), region = 130 }
 0x533   :  { %975 = vsyncpa [#allocation7], 1 }
 0x534   :  { %977 = vsyncpa [#allocation7 + $0x1], 1 }
 0x535   :  { %978 = vsyncpa [#allocation10], 1 }
 0x536   :  { %980 = vsyncpa [#allocation10 + $0x1], 1 }
 0x537   :  { %981 = vsyncpa [#allocation13], 1 }
 0x538   :  { %982 = vsyncpa [#allocation16], 1 }
 0x539   :  { %983 = vsyncpa [#allocation8], 1 }
 0x53a   :  { %985 = vsyncpa [#allocation8 + $0x1], 1 }

</bundles_post_ra>
